<compile_context>
chip_gen: v5e
topology: v5e:2x2
jax: 0.10.0
libtpu: 0.0.40
codegen_flags: <defaults>
</compile_context>

<pallas_src>
import jax
import jax.numpy as jnp
from jax.experimental import pallas as pl
from jax.experimental.pallas import tpu as pltpu

IN_DIM = 288
HID_DIM = 256
OUT_DIM = 128


def _round_up(a, m):
    return ((a + m - 1) // m) * m


def _has_megacore():
    # Only v7x (2 TensorCores per chip among v5e/v6e/v7x) benefits from
    # splitting a single-tile batch across grid steps.
    try:
        kind = jax.devices()[0].device_kind.lower()
    except Exception:
        return False
    return "v7" in kind


def fuse_kernel(x_ref, w1_ref, b1_ref, w2_ref, b2_ref, o_ref):
    # x arrives f32 straight from HBM; cast to bf16 on the VPU so the first
    # matmul takes the bf16 MXU path with f32 accumulation.
    x_bf = x_ref[...].astype(jnp.bfloat16)
    h = jnp.dot(x_bf, w1_ref[...], preferred_element_type=jnp.float32)
    # Bias + ReLU in f32 (VPU).
    h = jnp.maximum(h + b1_ref[...], 0.0)
    # Keep h in f32 for the second matmul (cheap; kernel is HBM-bound) to avoid
    # compounding bf16 rounding. W2 is stored bf16 in HBM to halve its traffic.
    y = jnp.dot(h, w2_ref[...].astype(jnp.float32),
                preferred_element_type=jnp.float32)
    y = y + b2_ref[...]
    o_ref[...] = y.astype(o_ref.dtype)


def fuse_nn_forward(x, w1, b1, w2, b2, *, tm=2048, out_dtype=jnp.float32):
    """x: [B, 288] float32 -> [B, 128].  Weights stored as [in, out]
    (x @ W + b, equivalent to PyTorch x @ W.T + b with W [out, in])."""
    B = x.shape[0]

    # Batch tile: as large as requested, capped by the sublane-rounded batch.
    tile_m = min(tm, _round_up(B, 8))
    # Split into >=2 grid steps only on v7x (2 TCs) and only when each core
    # still gets substantial work (>=512 rows per step).
    if _has_megacore() and pl.cdiv(B, tile_m) < 2 and B >= 1024:
        tile_m = _round_up(pl.cdiv(B, 2), 8)

    grid = (pl.cdiv(B, tile_m),)

    # Weights in bf16 for the MXU; biases f32.  x is NOT cast here (in-kernel).
    w1_bf = w1.astype(jnp.bfloat16)
    w2_bf = w2.astype(jnp.bfloat16)
    b1_f = b1.astype(jnp.float32).reshape(1, HID_DIM)
    b2_f = b2.astype(jnp.float32).reshape(1, OUT_DIM)

    flops = 2 * B * (IN_DIM * HID_DIM + HID_DIM * OUT_DIM)
    bytes_accessed = (B * IN_DIM * 4                                # x (f32)
                      + B * OUT_DIM * jnp.dtype(out_dtype).itemsize  # output
                      + IN_DIM * HID_DIM * 2 + HID_DIM * OUT_DIM * 2  # W bf16
                      + (HID_DIM + OUT_DIM) * 4)                    # biases

    return pl.pallas_call(
        fuse_kernel,
        out_shape=jax.ShapeDtypeStruct((B, OUT_DIM), out_dtype),
        grid_spec=pltpu.PrefetchScalarGridSpec(
            num_scalar_prefetch=0,
            grid=grid,
            in_specs=[
                pl.BlockSpec((tile_m, IN_DIM), lambda i: (i, 0)),    # x tile (f32)
                pl.BlockSpec((IN_DIM, HID_DIM), lambda i: (0, 0)),   # W1 (resident)
                pl.BlockSpec((1, HID_DIM), lambda i: (0, 0)),        # b1
                pl.BlockSpec((HID_DIM, OUT_DIM), lambda i: (0, 0)),  # W2 (resident)
                pl.BlockSpec((1, OUT_DIM), lambda i: (0, 0)),        # b2
            ],
            out_specs=pl.BlockSpec((tile_m, OUT_DIM), lambda i: (i, 0)),
        ),
        compiler_params=pltpu.CompilerParams(
            dimension_semantics=("parallel",),
            vmem_limit_bytes=32 * 1024 * 1024,   # safe on v5e/v6e/v7x
        ),
        cost_estimate=pl.CostEstimate(
            flops=flops, transcendentals=0, bytes_accessed=bytes_accessed),
    )(x, w1_bf, b1_f, w2_bf, b2_f)


def reference_forward(x, w1, b1, w2, b2):
    h = jnp.maximum(x @ w1 + b1, 0.0)
    return h @ w2 + b2


if __name__ == "__main__":
    key = jax.random.PRNGKey(0)
    k_x, k_w1, k_b1, k_w2, k_b2 = jax.random.split(key, 5)

    # Deterministic parameter init (uniform, roughly PyTorch-Linear-like scale).
    lim1 = 1.0 / (IN_DIM ** 0.5)
    lim2 = 1.0 / (HID_DIM ** 0.5)
    w1 = jax.random.uniform(k_w1, (IN_DIM, HID_DIM), jnp.float32, -lim1, lim1)
    b1 = jax.random.uniform(k_b1, (1, HID_DIM), jnp.float32, -lim1, lim1)
    w2 = jax.random.uniform(k_w2, (HID_DIM, OUT_DIM), jnp.float32, -lim2, lim2)
    b2 = jax.random.uniform(k_b2, (1, OUT_DIM), jnp.float32, -lim2, lim2)

    # (B, tm) cases: aligned tiny batch, ragged single-step batch, and a ragged
    # multi-step grid (exercises the pad-free partial last block).
    for B, tile in ((8, 2048), (300, 2048), (300, 128)):
        x = jax.random.normal(jax.random.fold_in(k_x, B), (B, IN_DIM), jnp.float32)
        out = jax.block_until_ready(fuse_nn_forward(x, w1, b1, w2, b2, tm=tile))
        ref = reference_forward(x, w1, b1, w2, b2)
        assert out.shape == (B, OUT_DIM)
        # bf16 MXU inputs for layer 1 (f32 accumulate, f32 layer 2) -> loosened
        # tolerance vs the pure-f32 reference.
        assert jnp.allclose(out, ref, atol=3e-2, rtol=3e-2), \
            f"mismatch at B={B}, tm={tile}"

    print("KERNEL_OK")
</pallas_src>

<mosaic_0001>
module attributes {stable_mosaic.version = 11 : i64} {
  func.func @fuse_kernel(%arg0: i32, %arg1: memref<8x288xf32, #tpu.memory_space<vmem>>, %arg2: memref<288x256xbf16, #tpu.memory_space<vmem>>, %arg3: memref<1x256xf32, #tpu.memory_space<vmem>>, %arg4: memref<256x128xbf16, #tpu.memory_space<vmem>>, %arg5: memref<1x128xf32, #tpu.memory_space<vmem>>, %arg6: memref<8x128xf32, #tpu.memory_space<vmem>>) attributes {dimension_semantics = [#tpu.dimension_semantics<parallel>], iteration_bounds = array<i64: 1>, scalar_prefetch = 0 : i64, scratch_operands = 0 : i64, tpu.core_type = #tpu.core_type<tc>, window_params = [{transform_indices = @transform_0, window_bounds = array<i64: 8, 288>}, {pipeline_mode = #tpu.pipeline_mode<synchronous>, transform_indices = @transform_1, window_bounds = array<i64: 288, 256>}, {pipeline_mode = #tpu.pipeline_mode<synchronous>, transform_indices = @transform_2, window_bounds = array<i64: 1, 256>}, {pipeline_mode = #tpu.pipeline_mode<synchronous>, transform_indices = @transform_3, window_bounds = array<i64: 256, 128>}, {pipeline_mode = #tpu.pipeline_mode<synchronous>, transform_indices = @transform_4, window_bounds = array<i64: 1, 128>}, {transform_indices = @transform_5, window_bounds = array<i64: 8, 128>}]} {
    %c0 = arith.constant 0 : index
    %c0_0 = arith.constant 0 : index
    %0 = vector.load %arg1[%c0, %c0_0] : memref<8x288xf32, #tpu.memory_space<vmem>>, vector<8x288xf32>
    %1 = arith.truncf %0 : vector<8x288xf32> to vector<8x288xbf16>
    %c0_1 = arith.constant 0 : index
    %c0_2 = arith.constant 0 : index
    %2 = vector.load %arg2[%c0_1, %c0_2] : memref<288x256xbf16, #tpu.memory_space<vmem>>, vector<288x256xbf16>
    %cst = arith.constant dense<0.000000e+00> : vector<8x256xf32>
    %3 = tpu.matmul %1, %2, %cst {dimension_numbers = #tpu.dot_dimension_numbers<[1], [0], [0], [1], [0, 0, 1, 1], [], []>} : vector<8x288xbf16>, vector<288x256xbf16>, vector<8x256xf32> -> vector<8x256xf32>
    %c0_3 = arith.constant 0 : index
    %c0_4 = arith.constant 0 : index
    %4 = vector.load %arg3[%c0_3, %c0_4] : memref<1x256xf32, #tpu.memory_space<vmem>>, vector<1x256xf32>
    %5 = vector.broadcast %4 : vector<1x256xf32> to vector<8x256xf32>
    %6 = arith.addf %3, %5 : vector<8x256xf32>
    %cst_5 = arith.constant 0.000000e+00 : f32
    %7 = vector.broadcast %cst_5 : f32 to vector<8x256xf32>
    %8 = arith.maximumf %6, %7 : vector<8x256xf32>
    %c0_6 = arith.constant 0 : index
    %c0_7 = arith.constant 0 : index
    %9 = vector.load %arg4[%c0_6, %c0_7] : memref<256x128xbf16, #tpu.memory_space<vmem>>, vector<256x128xbf16>
    %10 = arith.extf %9 : vector<256x128xbf16> to vector<256x128xf32>
    %cst_8 = arith.constant dense<0.000000e+00> : vector<8x128xf32>
    %11 = tpu.matmul %8, %10, %cst_8 {dimension_numbers = #tpu.dot_dimension_numbers<[1], [0], [0], [1], [0, 0, 1, 1], [], []>} : vector<8x256xf32>, vector<256x128xf32>, vector<8x128xf32> -> vector<8x128xf32>
    %c0_9 = arith.constant 0 : index
    %c0_10 = arith.constant 0 : index
    %12 = vector.load %arg5[%c0_9, %c0_10] : memref<1x128xf32, #tpu.memory_space<vmem>>, vector<1x128xf32>
    %13 = vector.broadcast %12 : vector<1x128xf32> to vector<8x128xf32>
    %14 = arith.addf %11, %13 : vector<8x128xf32>
    %c0_11 = arith.constant 0 : index
    %c0_12 = arith.constant 0 : index
    %15 = vector.load %arg6[%c0_11, %c0_12] : memref<8x128xf32, #tpu.memory_space<vmem>>, vector<8x128xf32>
    tpu.vector_store %arg6[%c0_11, %c0_12], %14 {strides = array<i32>} : memref<8x128xf32, #tpu.memory_space<vmem>>, vector<8x128xf32>,
    return
  }
  func.func @transform_0(%arg0: i32) -> (i32, i32) {
    %c0_i32 = arith.constant 0 : i32
    %c0_i32_0 = arith.constant 0 : i32
    return %arg0, %c0_i32 : i32, i32
  }
  func.func @transform_1(%arg0: i32) -> (i32, i32) {
    %c0_i32 = arith.constant 0 : i32
    %c0_i32_0 = arith.constant 0 : i32
    %c0_i32_1 = arith.constant 0 : i32
    return %c0_i32, %c0_i32_0 : i32, i32
  }
  func.func @transform_2(%arg0: i32) -> (i32, i32) {
    %c0_i32 = arith.constant 0 : i32
    %c0_i32_0 = arith.constant 0 : i32
    %c0_i32_1 = arith.constant 0 : i32
    return %c0_i32, %c0_i32_0 : i32, i32
  }
  func.func @transform_3(%arg0: i32) -> (i32, i32) {
    %c0_i32 = arith.constant 0 : i32
    %c0_i32_0 = arith.constant 0 : i32
    %c0_i32_1 = arith.constant 0 : i32
    return %c0_i32, %c0_i32_0 : i32, i32
  }
  func.func @transform_4(%arg0: i32) -> (i32, i32) {
    %c0_i32 = arith.constant 0 : i32
    %c0_i32_0 = arith.constant 0 : i32
    %c0_i32_1 = arith.constant 0 : i32
    return %c0_i32, %c0_i32_0 : i32, i32
  }
  func.func @transform_5(%arg0: i32) -> (i32, i32) {
    %c0_i32 = arith.constant 0 : i32
    %c0_i32_0 = arith.constant 0 : i32
    return %arg0, %c0_i32 : i32, i32
  }
}

</mosaic_0001>

<bundles_post_ra>
// kernel: tpu_custom_call.1
= control target key start
LH: loop header
LB: loop body
LE: loop exit
PB: predicated region body
PF: predicated region fallthrough
CT: control target
= control target key end

     0   :  { %10 = vsyncpa [#allocation3], 0  ;;  %s983_s0 = inlined_call_operand.hbm [shape: f32[8,288], index: 0, kind: input, shape index: {}]   ;;  %s984_s1 = inlined_call_operand.hbm [shape: bf16[288,256], index: 1, kind: input, shape index: {}]   ;;  %s985_s2 = inlined_call_operand.hbm [shape: f32[1,256], index: 2, kind: input, shape index: {}]   ;;  %s986_s3 = inlined_call_operand.hbm [shape: bf16[256,128], index: 3, kind: input, shape index: {}]   ;;  %s987_s4 = inlined_call_operand.vmem [shape: f32[1,128], index: 4, kind: input, shape index: {}]   ;;  %s988_s5 = inlined_call_operand.hbm [shape: f32[8,128], index: 5, kind: output, shape index: {}]  }
   0x1   :  { %11 = vsyncpa [#allocation6], 0 }
   0x2   :  { %12 = vsyncpa [#allocation9], 0  ;;  %s29_s20 = sshll.u32 %s984_s1, 4  ;;  %s30_s20 = int_to_ptr.hbm [resolvable:$true] %s29_s20 }
   0x3   :  { %13 = vsyncpa [#allocation4], 0  ;;  %s920_s21 = smov [#allocation5]   ;;  %s19_s25 = sshll.u32 %s983_s0, 4  ;;  %s20_s25 = int_to_ptr.hbm [resolvable:$true] %s19_s25 }
   0x4   :  { %s31_s22 = sshll.u32 %s920_s21, 4  ;;  %s921_s26 = smov 128   ;;  %s32_s22 = int_to_ptr.vmem [resolvable:$true] %s31_s22 }
   0x5   :  { %s922_s27 = smov 8   ;;  %s923_s28 = smov [#allocation2]  }
   0x6   :  { %37 = dma.hbm_to_vmem [thread:$0]  %s30_s20, 4608, %s32_s22, [#allocation6], %s921_s26, %s921_s26, %s922_s27  }
   0x7   :  { %s21_s29 = sshll.u32 %s923_s28, 4  ;;  %s43_s7 = sshll.u32 %s985_s2, 4  ;;  %s22_s29 = int_to_ptr.vmem [resolvable:$true] %s21_s29  ;;  %s44_s7 = int_to_ptr.hbm [resolvable:$true] %s43_s7 }
   0x8   :  { %24 = dma.hbm_to_vmem [thread:$0]  %s20_s25, 384, %s22_s29, [#allocation3]  }
   0x9   :  { %s53_s9 = sshll.u32 %s986_s3, 4  ;;  %s924_s10 = smov [#allocation7]   ;;  %s54_s9 = int_to_ptr.hbm [resolvable:$true] %s53_s9 }
   0xa   :  { %s45_s11 = sshll.u32 %s924_s10, 4  ;;  %s925_s0 = smov [#allocation8]   ;;  %s46_s11 = int_to_ptr.vmem [resolvable:$true] %s45_s11 }
   0xb   :  { %48 = dma.hbm_to_vmem [thread:$0]  %s44_s7, 32, %s46_s11, [#allocation6]  }
   0xc   :  { %s55_s12 = sshll.u32 %s925_s0, 4  ;;  %s926_s13 = smov 64   ;;  %s56_s12 = int_to_ptr.vmem [resolvable:$true] %s55_s12 }
   0xd   :  { %s927_s14 = smov 4  }
   0xe   :  { %61 = dma.hbm_to_vmem [thread:$0]  %s54_s9, 2048, %s56_s12, [#allocation9], %s926_s13, %s926_s13, %s927_s14  }
   0xf   :  { %912 = dma.done.wait [#allocation3], 384  }
  0x10   :  { %913 = vsyncadd [#allocation3], 4294966912 }
  0x11   :  { %914 = dma.done.wait [#allocation6], 4640  }
  0x12   :  { %915 = vsyncadd [#allocation6], 4294962656 }
  0x13   :  { %916 = dma.done.wait [#allocation9], 2048  }
  0x14   :  { %917 = vsyncadd [#allocation9], 4294965248  ;;  %v579_v0 = vld [vmem:[#allocation5 + $0x70] sm:$0xf]  ;;  %v682_v1 = vld [vmem:[#allocation5 + $0x74] sm:$0xf0] }
  0x15   :  { %v659_v2 = vld [vmem:[#allocation5 + $0x110] sm:$0xf]  ;;  %v580_v3 = vor.u32 %v682_v1, %v579_v0  ;;  %v702_v4 = vld [vmem:[#allocation5 + $0x114] sm:$0xf0]  ;;  %v681_v5 = vld [vmem:[#allocation5 + $0x74] sm:$0xf] }
  0x16   :  { %v581_v6 = vld [vmem:[#allocation5 + $0x78] sm:$0xf0]  ;;  %v660_v7 = vor.u32 %v702_v4, %v659_v2  ;;  %v643_v9 = vld [vmem:[#allocation5 + $0xf0] sm:$0xf]  ;;  %v698_v10 = vld [vmem:[#allocation5 + $0xf4] sm:$0xf0] }
  0x17   :  { %v584_v8 = vor.u32 %v681_v5, %v581_v6  ;;  %v571_v11 = vld [vmem:[#allocation5 + $0x60] sm:$0xf]  ;;  %313 = vmatpush.bf16.msra.mxu0 %v580_v3  ;;  %v644_v12 = vor.u32 %v698_v10, %v643_v9  ;;  %v680_v13 = vld [vmem:[#allocation5 + $0x64] sm:$0xf0]  ;;  %v679_v18 = vld [vmem:[#allocation5 + $0x64] sm:$0xf] }
  0x18   :  { %v651_v14 = vld [vmem:[#allocation5 + $0x100] sm:$0xf]  ;;  %v700_v15 = vld [vmem:[#allocation5 + $0x104] sm:$0xf0]  ;;  %345 = vmatpush.bf16.msra.mxu2 %v660_v7  ;;  %v572_v16 = vor.u32 %v680_v13, %v571_v11  ;;  %v573_v19 = vld [vmem:[#allocation5 + $0x68] sm:$0xf0] }
  0x19   :  { %352 = vmatpush.bf16.msra.mxu3 %v584_v8  ;;  %v652_v17 = vor.u32 %v700_v15, %v651_v14  ;;  %v697_v20 = vld [vmem:[#allocation5 + $0xf4] sm:$0xf]  ;;  %326 = vmatpush.bf16.msra.mxu1 %v644_v12  ;;  %v576_v21 = vor.u32 %v679_v18, %v573_v19  ;;  %v645_v22 = vld [vmem:[#allocation5 + $0xf8] sm:$0xf0]  ;;  %v635_v23 = vld [vmem:[#allocation5 + $0xe0] sm:$0xf] }
  0x1a   :  { %v696_v24 = vld [vmem:[#allocation5 + $0xe4] sm:$0xf0]  ;;  %v648_v25 = vor.u32 %v697_v20, %v645_v22  ;;  %v563_v27 = vld [vmem:[#allocation5 + $0x50] sm:$0xf]  ;;  %v678_v28 = vld [vmem:[#allocation5 + $0x54] sm:$0xf0] }
  0x1b   :  { %v636_v26 = vor.u32 %v696_v24, %v635_v23  ;;  %v677_v29 = vld [vmem:[#allocation5 + $0x54] sm:$0xf]  ;;  %314 = vmatpush.bf16.msra.mxu0 %v572_v16  ;;  %v564_v30 = vor.u32 %v678_v28, %v563_v27  ;;  %v565_v31 = vld [vmem:[#allocation5 + $0x58] sm:$0xf0]  ;;  %v695_v32 = vld [vmem:[#allocation5 + $0xe4] sm:$0xf] }
  0x1c   :  { %v637_v33 = vld [vmem:[#allocation5 + $0xe8] sm:$0xf0]  ;;  %346 = vmatpush.bf16.msra.mxu2 %v652_v17  ;;  %v568_v34 = vor.u32 %v677_v29, %v565_v31  ;;  %v627_v35 = vld [vmem:[#allocation5 + $0xd0] sm:$0xf]  ;;  %v694_v36 = vld [vmem:[#allocation5 + $0xd4] sm:$0xf0] }
  0x1d   :  { %353 = vmatpush.bf16.msra.mxu3 %v576_v21  ;;  %v555_v37 = vld [vmem:[#allocation5 + $0x40] sm:$0xf]  ;;  %327 = vmatpush.bf16.msra.mxu1 %v636_v26  ;;  %v640_v38 = vor.u32 %v695_v32, %v637_v33  ;;  %v628_v39 = vor.u32 %v694_v36, %v627_v35  ;;  %v676_v40 = vld [vmem:[#allocation5 + $0x44] sm:$0xf0]  ;;  %v675_v41 = vld [vmem:[#allocation5 + $0x44] sm:$0xf] }
  0x1e   :  { %v557_v42 = vld [vmem:[#allocation5 + $0x48] sm:$0xf0]  ;;  %v693_v43 = vld [vmem:[#allocation5 + $0xd4] sm:$0xf]  ;;  %v629_v44 = vld [vmem:[#allocation5 + $0xd8] sm:$0xf0]  ;;  %v556_v46 = vor.u32 %v676_v40, %v555_v37 }
  0x1f   :  { %v619_v45 = vld [vmem:[#allocation5 + $0xc0] sm:$0xf]  ;;  %315 = vmatpush.bf16.msra.mxu0 %v564_v30  ;;  %v692_v47 = vld [vmem:[#allocation5 + $0xc4] sm:$0xf0]  ;;  %v83_v48 = vld [vmem:[#allocation2 + $0x10] sm:$0xff]  ;;  %vm309_vm0 = vcmask 261120   ;;  %v560_v49 = vor.u32 %v675_v41, %v557_v42  ;;  %v632_v53 = vor.u32 %v693_v43, %v629_v44 }
  0x20   :  { %365 = vmatpush.bf16.msrb.mxu2 %v648_v25  ;;  %v971_v50 = vpack.c.bf16 %v83_v48, %v83_v48  ;;  %v547_v51 = vld [vmem:[#allocation5 + $0x30] sm:$0xf]  ;;  %v674_v52 = vld [vmem:[#allocation5 + $0x34] sm:$0xf0]  ;;  %v620_v54 = vor.u32 %v692_v47, %v619_v45  ;;  %v673_v55 = vld [vmem:[#allocation5 + $0x34] sm:$0xf] }
  0x21   :  { %354 = vmatpush.bf16.msra.mxu3 %v568_v34  ;;  %328 = vmatpush.bf16.msra.mxu1 %v628_v39  ;;  %v549_v56 = vld [vmem:[#allocation5 + $0x38] sm:$0xf0]  ;;  %v691_v57 = vld [vmem:[#allocation5 + $0xc4] sm:$0xf]  ;;  %v621_v58 = vld [vmem:[#allocation5 + $0xc8] sm:$0xf0]  ;;  %v548_v61 = vor.u32 %v674_v52, %v547_v51 }
  0x22   :  { %665 = vmatmul.msk.bf16.vlgmr.msra.gmra.mxu2 %vm309_vm0, %v971_v50  ;;  %v611_v59 = vld [vmem:[#allocation5 + $0xb0] sm:$0xf]  ;;  %v690_v60 = vld [vmem:[#allocation5 + $0xb4] sm:$0xf0]  ;;  %v552_v62 = vor.u32 %v673_v55, %v549_v56  ;;  %v539_v63 = vld [vmem:[#allocation5 + $0x20] sm:$0xf]  ;;  %v624_v1 = vor.u32 %v691_v57, %v621_v58 }
  0x23   :  { %316 = vmatpush.bf16.msra.mxu0 %v556_v46  ;;  %v672_v0 = vld [vmem:[#allocation5 + $0x24] sm:$0xf0]  ;;  %v612_v2 = vor.u32 %v690_v60, %v611_v59  ;;  %v671_v3 = vld [vmem:[#allocation5 + $0x24] sm:$0xf]  ;;  %v541_v4 = vld [vmem:[#allocation5 + $0x28] sm:$0xf0] }
  0x24   :  { %366 = vmatpush.bf16.msrb.mxu2 %v640_v38  ;;  %v689_v5 = vld [vmem:[#allocation5 + $0xb4] sm:$0xf]  ;;  %v613_v6 = vld [vmem:[#allocation5 + $0xb8] sm:$0xf0]  ;;  %v603_v7 = vld [vmem:[#allocation5 + $0xa0] sm:$0xf]  ;;  %v540_v9 = vor.u32 %v672_v0, %v539_v63  ;;  %v544_v10 = vor.u32 %v671_v3, %v541_v4 }
  0x25   :  { %355 = vmatpush.bf16.msra.mxu3 %v560_v49  ;;  %329 = vmatpush.bf16.msra.mxu1 %v620_v54  ;;  %v688_v8 = vld [vmem:[#allocation5 + $0xa4] sm:$0xf0]  ;;  %v531_v11 = vld [vmem:[#allocation5 + $0x10] sm:$0xf]  ;;  %v670_v12 = vld [vmem:[#allocation5 + $0x14] sm:$0xf0]  ;;  %v616_v13 = vor.u32 %v689_v5, %v613_v6 }
  0x26   :  { %v604_v14 = vor.u32 %v688_v8, %v603_v7  ;;  %v669_v15 = vld [vmem:[#allocation5 + $0x14] sm:$0xf]  ;;  %v533_v16 = vld [vmem:[#allocation5 + $0x18] sm:$0xf0]  ;;  %v687_v17 = vld [vmem:[#allocation5 + $0xa4] sm:$0xf]  ;;  %v532_v21 = vor.u32 %v670_v12, %v531_v11 }
  0x27   :  { %317 = vmatpush.bf16.msra.mxu0 %v548_v61  ;;  %v605_v18 = vld [vmem:[#allocation5 + $0xa8] sm:$0xf0]  ;;  %v595_v19 = vld [vmem:[#allocation5 + $0x90] sm:$0xf]  ;;  %v686_v20 = vld [vmem:[#allocation5 + $0x94] sm:$0xf0]  ;;  %v536_v24 = vor.u32 %v669_v15, %v533_v16 }
  0x28   :  { %367 = vmatpush.bf16.msrb.mxu2 %v632_v53  ;;  %v523_v22 = vld [vmem:[#allocation5] sm:$0xf]  ;;  %v668_v23 = vld [vmem:[#allocation5 + $0x4] sm:$0xf0]  ;;  %v667_v25 = vld [vmem:[#allocation5 + $0x4] sm:$0xf]  ;;  %v608_v28 = vor.u32 %v687_v17, %v605_v18  ;;  %v596_v29 = vor.u32 %v686_v20, %v595_v19 }
  0x29   :  { %356 = vmatpush.bf16.msra.mxu3 %v552_v62  ;;  %330 = vmatpush.bf16.msra.mxu1 %v612_v2  ;;  %v525_v26 = vld [vmem:[#allocation5 + $0x8] sm:$0xf0]  ;;  %v685_v27 = vld [vmem:[#allocation5 + $0x94] sm:$0xf]  ;;  %v597_v30 = vld [vmem:[#allocation5 + $0x98] sm:$0xf0]  ;;  %v524_v35 = vor.u32 %v668_v23, %v523_v22 }
  0x2a   :  { %v701_v31 = vld [vmem:[#allocation5 + $0x114] sm:$0xf]  ;;  %v661_v32 = vld [vmem:[#allocation5 + $0x118] sm:$0xf0]  ;;  %v587_v33 = vld [vmem:[#allocation5 + $0x80] sm:$0xf]  ;;  %v528_v38 = vor.u32 %v667_v25, %v525_v26  ;;  %v600_v40 = vor.u32 %v685_v27, %v597_v30 }
  0x2b   :  { %318 = vmatpush.bf16.msra.mxu0 %v540_v9  ;;  %v684_v34 = vld [vmem:[#allocation5 + $0x84] sm:$0xf0]  ;;  %v773_v37 = vld [vmem:[#allocation8 + $0x38] sm:$0xff]   ;;  %v664_v39 = vor.u32 %v701_v31, %v661_v32  ;;  %v82_v42 = vld [vmem:[#allocation2 + $0x8] sm:$0xff]  ;;  %s928_s15 = smov [#allocation10]   ;;  %s509_s19 = sshll.u32 %s988_s5, 4  ;;  %s510_s19 = int_to_ptr.hbm [resolvable:$true] %s509_s19 }
  0x2c   :  { %368 = vmatpush.bf16.msrb.mxu2 %v624_v1  ;;  %v81_v36 = vld [vmem:[#allocation2] sm:$0xff]  ;;  %v588_v41 = vor.u32 %v684_v34, %v587_v33  ;;  %v699_v43 = vld [vmem:[#allocation5 + $0x104] sm:$0xf]  ;;  %v734_v48 = vunpack.c.h.bf16 %v773_v37  ;;  %v85_v49 = vpack.c.bf16 %v82_v42, %v82_v42  ;;  %v772_v52 = vld [vmem:[#allocation8 + $0x30] sm:$0xff]   ;;  %v733_v54 = vunpack.c.l.bf16 %v773_v37  ;;  %s507_s16 = sshll.u32 %s928_s15, 4  ;;  %s508_s16 = int_to_ptr.vmem [resolvable:$true] %s507_s16 }
  0x2d   :  { %357 = vmatpush.bf16.msra.mxu3 %v544_v10  ;;  %331 = vmatpush.bf16.msra.mxu1 %v604_v14  ;;  %v653_v44 = vld [vmem:[#allocation5 + $0x108] sm:$0xf0]  ;;  %v84_v45 = vpack.c.bf16 %v81_v36, %v81_v36  ;;  %v683_v46 = vld [vmem:[#allocation5 + $0x84] sm:$0xf]  ;;  %v730_v55 = vunpack.c.h.bf16 %v772_v52  ;;  %v729_v57 = vunpack.c.l.bf16 %v772_v52  ;;  %v781_v61 = vld [vmem:[#allocation8 + $0x78] sm:$0xff]  }
  0x2e   :  { %v589_v47 = vld [vmem:[#allocation5 + $0x88] sm:$0xf0]  ;;  %v656_v51 = vor.u32 %v699_v43, %v653_v44  ;;  %v770_v60 = vld [vmem:[#allocation8 + $0x20] sm:$0xff]   ;;  %v769_v62 = vld [vmem:[#allocation8 + $0x18] sm:$0xff]   ;;  %v766_v0 = vunpack.c.h.bf16 %v781_v61  ;;  %v765_v2 = vunpack.c.l.bf16 %v781_v61 }
  0x2f   :  { %319 = vmatpush.bf16.msra.mxu0 %v532_v21  ;;  %v592_v53 = vor.u32 %v683_v46, %v589_v47  ;;  %v771_v56 = vld [vmem:[#allocation8 + $0x28] sm:$0xff]   ;;  %v722_v63 = vunpack.c.h.bf16 %v770_v60  ;;  %v721_v1 = vunpack.c.l.bf16 %v770_v60  ;;  %v780_v3 = vld [vmem:[#allocation8 + $0x70] sm:$0xff]   ;;  %v718_v4 = vunpack.c.h.bf16 %v769_v62  ;;  %v778_v14 = vld [vmem:[#allocation8 + $0x60] sm:$0xff]  }
  0x30   :  { %369 = vmatpush.bf16.msrb.mxu2 %v616_v13  ;;  %v726_v58 = vunpack.c.h.bf16 %v771_v56  ;;  %v725_v59 = vunpack.c.l.bf16 %v771_v56  ;;  %v762_v5 = vunpack.c.h.bf16 %v780_v3  ;;  %v717_v6 = vunpack.c.l.bf16 %v769_v62  ;;  %v768_v8 = vld [vmem:[#allocation8 + $0x10] sm:$0xff]   ;;  %v767_v13 = vld [vmem:[#allocation8 + $0x8] sm:$0xff]   ;;  %v704_v19 = vld [vmem:[#allocation8] sm:$0xff]  }
  0x31   :  { %358 = vmatpush.bf16.msra.mxu3 %v536_v24  ;;  %332 = vmatpush.bf16.msra.mxu1 %v596_v29  ;;  %v761_v7 = vunpack.c.l.bf16 %v780_v3  ;;  %v714_v9 = vunpack.c.h.bf16 %v768_v8  ;;  %v713_v11 = vunpack.c.l.bf16 %v768_v8  ;;  %v710_v15 = vunpack.c.h.bf16 %v767_v13  ;;  %v777_v20 = vld [vmem:[#allocation8 + $0x58] sm:$0xff]   ;;  %v776_v25 = vld [vmem:[#allocation8 + $0x50] sm:$0xff]   ;;  %v774_v31 = vld [vmem:[#allocation8 + $0x40] sm:$0xff]  }
  0x32   :  { %v754_v16 = vunpack.c.h.bf16 %v778_v14  ;;  %v709_v17 = vunpack.c.l.bf16 %v767_v13  ;;  %v753_v18 = vunpack.c.l.bf16 %v778_v14  ;;  %v706_v21 = vunpack.c.h.bf16 %v704_v19  ;;  %v123_v36 = vld [vmem:[#allocation7] sm:$0x3] }
  0x33   :  { %320 = vmatpush.bf16.msra.mxu0 %v524_v35  ;;  %v750_v22 = vunpack.c.h.bf16 %v777_v20  ;;  %v705_v23 = vunpack.c.l.bf16 %v704_v19  ;;  %v749_v24 = vunpack.c.l.bf16 %v777_v20  ;;  %v746_v26 = vunpack.c.h.bf16 %v776_v25 }
  0x34   :  { %370 = vmatpush.bf16.msrb.mxu2 %v608_v28  ;;  %v745_v27 = vunpack.c.l.bf16 %v776_v25  ;;  %v775_v28 = vld [vmem:[#allocation8 + $0x48] sm:$0xff]   ;;  %v738_v32 = vunpack.c.h.bf16 %v774_v31  ;;  %v737_v34 = vunpack.c.l.bf16 %v774_v31  ;;  %v125_v37 = vperm.slane %v123_v36, 0 }
  0x35   :  { %359 = vmatpush.bf16.msra.mxu3 %v528_v38  ;;  %333 = vmatpush.bf16.msra.mxu1 %v588_v41  ;;  %v742_v29 = vunpack.c.h.bf16 %v775_v28  ;;  %v741_v30 = vunpack.c.l.bf16 %v775_v28  ;;  %v126_v43 = vperm.slane %v123_v36, 1 }
  0x36   :  { %321 = vmatmul.bf16.vlgmr.msra.gmra.mxu0 %v84_v45 }
  0x37   :  { %384 = vmatpush.bf16.msrb.mxu0 %v664_v39 }
  0x38   :  { %371 = vmatpush.bf16.msrb.mxu2 %v600_v40  ;;  %360 = vmatmul.bf16.vlgmr.msra.gmra.mxu3 %v84_v45 }
  0x39   :  { %461 = vmatpush.msrb.mxu1 %v734_v48  ;;  %481 = vmatpush.msrb.mxu3 %v766_v0 }
  0x3a   :  { %334 = vmatmul.bf16.vlgmr.msra.gmra.mxu1 %v85_v49 }
  0x3b   :  { %385 = vmatpush.bf16.msrb.mxu0 %v656_v51  ;;  %462 = vmatpush.msrb.mxu1 %v733_v54 }
  0x3c   :  { %372 = vmatpush.bf16.msrb.mxu2 %v592_v53  ;;  %482 = vmatpush.msrb.mxu3 %v765_v2 }
  0x3d   :  { %463 = vmatpush.msrb.mxu1 %v730_v55 }
  0x3e   :  { %483 = vmatpush.msrb.mxu3 %v762_v5 }
  0x3f   :  { %373 = vmatmul.bf16.vlgmr.msrb.gmra.mxu2 %v85_v49  ;;  %464 = vmatpush.msrb.mxu1 %v729_v57 }
  0x40   :  { %484 = vmatpush.msrb.mxu3 %v761_v7 }
  0x41   :  { %465 = vmatpush.msrb.mxu1 %v726_v58  ;;  %v791_v58 = vld [vmem:[%s987_s4] ss:$0 sm:$0xff] }
  0x43   :  { %466 = vmatpush.msrb.mxu1 %v725_v59 }
  0x45   :  { %467 = vmatpush.msrb.mxu1 %v722_v63 }
  0x46   :  { %666 = vmatmul.msk.bf16.vlgmr.msrb.gmra.mxu0 %vm309_vm0, %v971_v50  ;;  %v779_v50 = vld [vmem:[#allocation8 + $0x68] sm:$0xff]  }
  0x47   :  { %468 = vmatpush.msrb.mxu1 %v721_v1  ;;  %v758_v10 = vunpack.c.h.bf16 %v779_v50  ;;  %v757_v12 = vunpack.c.l.bf16 %v779_v50 }
  0x49   :  { %469 = vmatpush.msrb.mxu1 %v718_v4  ;;  %485 = vmatpush.msrb.mxu3 %v758_v10 }
  0x4b   :  { %470 = vmatpush.msrb.mxu1 %v717_v6  ;;  %486 = vmatpush.msrb.mxu3 %v757_v12 }
  0x4d   :  { %471 = vmatpush.msrb.mxu1 %v714_v9  ;;  %487 = vmatpush.msrb.mxu3 %v754_v16 }
  0x4f   :  { %472 = vmatpush.msrb.mxu1 %v713_v11  ;;  %488 = vmatpush.msrb.mxu3 %v753_v18 }
  0x51   :  { %473 = vmatpush.msrb.mxu1 %v710_v15  ;;  %489 = vmatpush.msrb.mxu3 %v750_v22 }
  0x53   :  { %474 = vmatpush.msrb.mxu1 %v709_v17  ;;  %490 = vmatpush.msrb.mxu3 %v749_v24 }
  0x55   :  { %475 = vmatpush.msrb.mxu1 %v706_v21  ;;  %491 = vmatpush.msrb.mxu3 %v746_v26 }
  0x57   :  { %476 = vmatpush.msrb.mxu1 %v705_v23  ;;  %492 = vmatpush.msrb.mxu3 %v745_v27 }
  0x59   :  { %493 = vmatpush.msrb.mxu3 %v742_v29 }
  0x5b   :  { %494 = vmatpush.msrb.mxu3 %v741_v30 }
  0x5d   :  { %495 = vmatpush.msrb.mxu3 %v738_v32 }
  0x5f   :  { %496 = vmatpush.msrb.mxu3 %v737_v34 }
  0xa5   :  { %v348_v33 = vpop.f32.mrf.mxu2 }
  0xad   :  { %v350_v35 = vpop.f32.mrf.mxu2 }
  0xb3   :  { %v322_v38 = vpop.f32.mrf.mxu0 }
  0xb4   :  { %v323_v39 = vadd.f32 %v322_v38, %v125_v37 }
  0xb7   :  { %v335_v40 = vpop.f32.mrf.mxu1 }
  0xb8   :  { %v336_v41 = vadd.f32 %v335_v40, %v323_v39 }
  0xba   :  { %v349_v42 = vadd.f32 %v348_v33, %v336_v41 }
  0xbb   :  { %v361_v45 = vpop.f32.mrf.mxu3  ;;  %v324_v46 = vpop.f32.mrf.mxu0 }
  0xbc   :  { %v391_v44 = vmax.f32 %v349_v42, 0.0  ;;  %v362_v47 = vadd.f32 %v361_v45, %v126_v43 }
  0xbe   :  { %477 = vmatmul.f32.vlgmr.msrb.gmra.mxu1 %v391_v44 }
  0xbf   :  { %v337_v48 = vpop.f32.mrf.mxu1 }
  0xc2   :  { %v374_v49 = vpop.f32.mrf.mxu2 }
  0xc3   :  { %v375_v51 = vadd.f32 %v374_v49, %v362_v47  ;;  %v363_v52 = vpop.f32.mrf.mxu3  ;;  %v387_v53 = vpop.f32.mrf.mxu0 }
  0xc5   :  { %v388_v54 = vadd.f32 %v387_v53, %v375_v51 }
  0xc7   :  { %v392_v55 = vmax.f32 %v388_v54, 0.0 }
  0xc9   :  { %497 = vmatmul.f32.vlgmr.msrb.gmra.mxu3 %v392_v55 }
  0xca   :  { %v376_v56 = vpop.f32.mrf.mxu2 }
  0xcb   :  { %v389_v57 = vpop.f32.mrf.mxu0 }
 0x13b   :  { %v478_v59 = vpop.f32.mrf.mxu1 }
 0x13c   :  { %v479_v60 = vadd.f32 %v791_v58, %v478_v59 }
 0x14c   :  { %v498_v61 = vpop.f32.mrf.mxu3 }
 0x14d   :  { %v499_v62 = vadd.f32 %v498_v61, %v479_v60 }
 0x14f   :  { %501 = vst [vmem:[#allocation10] sm:$0xff] %v499_v62 }
 0x150   :  { %512 = dma.vmem_to_hbm [thread:$0]  %s508_s16, 128, %s510_s19, [#allocation4]  }
 0x151   :  { %918 = dma.done.wait [#allocation4], 128  }
 0x152   :  { %919 = vsyncadd [#allocation4], 4294967168 }
 0x153   :  { %517 = vsyncpa [#allocation3], 1 }
 0x154   :  { %518 = vsyncpa [#allocation6], 1 }
 0x155   :  { %519 = vsyncpa [#allocation9], 1 }
 0x156   :  { %520 = vsyncpa [#allocation4], 1 }

</bundles_post_ra>
